<compile_context>
chip_gen: v5e
topology: v5e:2x2
jax: 0.10.0
libtpu: 0.0.40
codegen_flags: <defaults>
</compile_context>

<pallas_src>
import functools

import jax
import jax.numpy as jnp
from jax.experimental import pallas as pl
from jax.experimental.pallas import tpu as pltpu

LANE = 128   # lane width (last dim)
SUBLANE = 8  # f32 sublane quantum (second-to-last dim)


def _round_up(x, m):
    return ((x + m - 1) // m) * m


def _fused_mlp_kernel(x_ref, *refs):
    """refs = (w0, b0, w1, b1, ..., wL-1, bL-1, out).  All tiles live in VMEM."""
    o_ref = refs[-1]
    wb = refs[:-1]
    n_layers = len(wb) // 2

    h = x_ref[...]
    for i in range(n_layers):  # unrolled at trace time
        w = wb[2 * i][...]
        b = wb[2 * i + 1][...]                      # (1, Dout) -> broadcasts over batch
        h = jnp.dot(h, w, preferred_element_type=jnp.float32)  # MXU, f32 accumulate
        h = jnp.maximum(h + b, 0.0)                 # bias + ReLU on VPU
    o_ref[...] = h.astype(o_ref.dtype)


def pad_ae_params(params):
    """Zero-pad weights/biases to lane-dense (multiple-of-128) feature dims.

    Done once, outside the per-call hot path.  Returns (padded list, dims, pdims)
    where dims are the true layer widths and pdims the padded ones.
    """
    dims = [params[0][0].shape[0]] + [w.shape[1] for (w, _) in params]
    pdims = [_round_up(d, LANE) for d in dims]

    padded = []
    for i, (w, b) in enumerate(params):
        din, dout = w.shape
        wp = jnp.zeros((pdims[i], pdims[i + 1]), w.dtype).at[:din, :dout].set(w)
        bp = jnp.zeros((1, pdims[i + 1]), b.dtype).at[0, :dout].set(b)
        padded.append((wp, bp))
    return padded, dims, pdims


@functools.partial(jax.jit, static_argnames=("dims", "pdims", "tb"))
def _ae_forward_padded(x, padded_flat, *, dims, pdims, tb):
    B, Din = x.shape
    Bp = _round_up(B, max(SUBLANE, tb))
    tb = min(tb, Bp)

    # Pad the activation slab: [B, Din] -> [Bp, pdims[0]] (lane-dense, sublane-aligned).
    xp = jnp.zeros((Bp, pdims[0]), x.dtype).at[:B, :Din].set(x)

    n_layers = len(padded_flat) // 2

    # Batch tiles stream through the grid; weights/biases are full-extent and
    # stay resident in VMEM across all grid steps.
    in_specs = [pl.BlockSpec((tb, pdims[0]), lambda i: (i, 0))]
    for li in range(n_layers):
        in_specs.append(pl.BlockSpec((pdims[li], pdims[li + 1]), lambda i: (0, 0)))
        in_specs.append(pl.BlockSpec((1, pdims[li + 1]), lambda i: (0, 0)))

    out_padded = pl.pallas_call(
        _fused_mlp_kernel,
        out_shape=jax.ShapeDtypeStruct((Bp, pdims[-1]), x.dtype),
        grid=(Bp // tb,),
        in_specs=in_specs,
        out_specs=pl.BlockSpec((tb, pdims[-1]), lambda i: (i, 0)),
        compiler_params=pltpu.CompilerParams(
            dimension_semantics=("parallel",),   # shards batch tiles across TCs (v7x)
        ),
    )(xp, *padded_flat)

    return out_padded[:B, :dims[-1]]


def ae_forward(x, padded_params, dims, pdims, *, tb=128):
    """Full AEModel forward (encoder then decoder, every layer Linear+ReLU)."""
    padded_flat = []
    for (w, b) in padded_params:
        padded_flat.extend([w, b])
    return _ae_forward_padded(
        x, tuple(padded_flat), dims=tuple(dims), pdims=tuple(pdims), tb=tb
    )


def init_ae_params(input_dim, n_neurons, key):
    """Mimics PyTorch nn.Linear default init: U(-1/sqrt(fan_in), 1/sqrt(fan_in))."""
    n_half = len(n_neurons) // 2
    enc_neurons = n_neurons[:n_half]
    dec_neurons = n_neurons[n_half:]
    dims = [input_dim] + enc_neurons + dec_neurons

    params = []
    for i in range(len(dims) - 1):
        d_in, d_out = dims[i], dims[i + 1]
        key, kw, kb = jax.random.split(key, 3)
        bound = 1.0 / (d_in ** 0.5)
        w = jax.random.uniform(kw, (d_in, d_out), jnp.float32, -bound, bound)
        b = jax.random.uniform(kb, (d_out,), jnp.float32, -bound, bound)
        params.append((w, b))
    return params


def ae_forward_ref(x, params):
    """Pure-JAX reference (full-precision matmuls) for correctness check."""
    h = x
    for (w, b) in params:
        h = jnp.maximum(
            jnp.dot(h, w, precision=jax.lax.Precision.HIGHEST) + b, 0.0
        )
    return h


if __name__ == "__main__":
    # Autoencoder: 64 -> [32, 16] (encoder) -> [32, 64] (decoder), batch = 8.
    input_dim = 64
    n_neurons = [32, 16, 32, 64]
    batch = 8

    key = jax.random.PRNGKey(0)
    key, kx = jax.random.split(key)
    x = jax.random.normal(kx, (batch, input_dim), jnp.float32)

    params = init_ae_params(input_dim, n_neurons, key)
    padded_params, dims, pdims = pad_ae_params(params)

    out = ae_forward(x, padded_params, dims, pdims)
    out = jax.block_until_ready(out)

    ref = ae_forward_ref(x, params)
    assert out.shape == (batch, n_neurons[-1])
    assert jnp.allclose(out, ref, atol=1e-5, rtol=1e-5)

    print("KERNEL_OK")
</pallas_src>

<mosaic_0001>
module attributes {stable_mosaic.version = 11 : i64} {
  func.func @_fused_mlp_kernel(%arg0: i32, %arg1: memref<128x128xf32, #tpu.memory_space<vmem>>, %arg2: memref<128x128xf32, #tpu.memory_space<vmem>>, %arg3: memref<1x128xf32, #tpu.memory_space<vmem>>, %arg4: memref<128x128xf32, #tpu.memory_space<vmem>>, %arg5: memref<1x128xf32, #tpu.memory_space<vmem>>, %arg6: memref<128x128xf32, #tpu.memory_space<vmem>>, %arg7: memref<1x128xf32, #tpu.memory_space<vmem>>, %arg8: memref<128x128xf32, #tpu.memory_space<vmem>>, %arg9: memref<1x128xf32, #tpu.memory_space<vmem>>, %arg10: memref<128x128xf32, #tpu.memory_space<vmem>>) attributes {dimension_semantics = [#tpu.dimension_semantics<parallel>], iteration_bounds = array<i64: 1>, scalar_prefetch = 0 : i64, scratch_operands = 0 : i64, tpu.core_type = #tpu.core_type<tc>, window_params = [{transform_indices = @transform_0, window_bounds = array<i64: 128, 128>}, {pipeline_mode = #tpu.pipeline_mode<synchronous>, transform_indices = @transform_1, window_bounds = array<i64: 128, 128>}, {pipeline_mode = #tpu.pipeline_mode<synchronous>, transform_indices = @transform_2, window_bounds = array<i64: 1, 128>}, {pipeline_mode = #tpu.pipeline_mode<synchronous>, transform_indices = @transform_3, window_bounds = array<i64: 128, 128>}, {pipeline_mode = #tpu.pipeline_mode<synchronous>, transform_indices = @transform_4, window_bounds = array<i64: 1, 128>}, {pipeline_mode = #tpu.pipeline_mode<synchronous>, transform_indices = @transform_5, window_bounds = array<i64: 128, 128>}, {pipeline_mode = #tpu.pipeline_mode<synchronous>, transform_indices = @transform_6, window_bounds = array<i64: 1, 128>}, {pipeline_mode = #tpu.pipeline_mode<synchronous>, transform_indices = @transform_7, window_bounds = array<i64: 128, 128>}, {pipeline_mode = #tpu.pipeline_mode<synchronous>, transform_indices = @transform_8, window_bounds = array<i64: 1, 128>}, {transform_indices = @transform_9, window_bounds = array<i64: 128, 128>}]} {
    %c0 = arith.constant 0 : index
    %c0_0 = arith.constant 0 : index
    %0 = vector.load %arg1[%c0, %c0_0] : memref<128x128xf32, #tpu.memory_space<vmem>>, vector<128x128xf32>
    %c0_1 = arith.constant 0 : index
    %c0_2 = arith.constant 0 : index
    %1 = vector.load %arg2[%c0_1, %c0_2] : memref<128x128xf32, #tpu.memory_space<vmem>>, vector<128x128xf32>
    %c0_3 = arith.constant 0 : index
    %c0_4 = arith.constant 0 : index
    %2 = vector.load %arg3[%c0_3, %c0_4] : memref<1x128xf32, #tpu.memory_space<vmem>>, vector<1x128xf32>
    %cst = arith.constant dense<0.000000e+00> : vector<128x128xf32>
    %3 = tpu.matmul %0, %1, %cst {dimension_numbers = #tpu.dot_dimension_numbers<[1], [0], [0], [1], [0, 0, 1, 1], [], []>} : vector<128x128xf32>, vector<128x128xf32>, vector<128x128xf32> -> vector<128x128xf32>
    %4 = vector.broadcast %2 : vector<1x128xf32> to vector<128x128xf32>
    %5 = arith.addf %3, %4 : vector<128x128xf32>
    %cst_5 = arith.constant 0.000000e+00 : f32
    %6 = vector.broadcast %cst_5 : f32 to vector<128x128xf32>
    %7 = arith.maximumf %5, %6 : vector<128x128xf32>
    %c0_6 = arith.constant 0 : index
    %c0_7 = arith.constant 0 : index
    %8 = vector.load %arg4[%c0_6, %c0_7] : memref<128x128xf32, #tpu.memory_space<vmem>>, vector<128x128xf32>
    %c0_8 = arith.constant 0 : index
    %c0_9 = arith.constant 0 : index
    %9 = vector.load %arg5[%c0_8, %c0_9] : memref<1x128xf32, #tpu.memory_space<vmem>>, vector<1x128xf32>
    %cst_10 = arith.constant dense<0.000000e+00> : vector<128x128xf32>
    %10 = tpu.matmul %7, %8, %cst_10 {dimension_numbers = #tpu.dot_dimension_numbers<[1], [0], [0], [1], [0, 0, 1, 1], [], []>} : vector<128x128xf32>, vector<128x128xf32>, vector<128x128xf32> -> vector<128x128xf32>
    %11 = vector.broadcast %9 : vector<1x128xf32> to vector<128x128xf32>
    %12 = arith.addf %10, %11 : vector<128x128xf32>
    %cst_11 = arith.constant 0.000000e+00 : f32
    %13 = vector.broadcast %cst_11 : f32 to vector<128x128xf32>
    %14 = arith.maximumf %12, %13 : vector<128x128xf32>
    %c0_12 = arith.constant 0 : index
    %c0_13 = arith.constant 0 : index
    %15 = vector.load %arg6[%c0_12, %c0_13] : memref<128x128xf32, #tpu.memory_space<vmem>>, vector<128x128xf32>
    %c0_14 = arith.constant 0 : index
    %c0_15 = arith.constant 0 : index
    %16 = vector.load %arg7[%c0_14, %c0_15] : memref<1x128xf32, #tpu.memory_space<vmem>>, vector<1x128xf32>
    %cst_16 = arith.constant dense<0.000000e+00> : vector<128x128xf32>
    %17 = tpu.matmul %14, %15, %cst_16 {dimension_numbers = #tpu.dot_dimension_numbers<[1], [0], [0], [1], [0, 0, 1, 1], [], []>} : vector<128x128xf32>, vector<128x128xf32>, vector<128x128xf32> -> vector<128x128xf32>
    %18 = vector.broadcast %16 : vector<1x128xf32> to vector<128x128xf32>
    %19 = arith.addf %17, %18 : vector<128x128xf32>
    %cst_17 = arith.constant 0.000000e+00 : f32
    %20 = vector.broadcast %cst_17 : f32 to vector<128x128xf32>
    %21 = arith.maximumf %19, %20 : vector<128x128xf32>
    %c0_18 = arith.constant 0 : index
    %c0_19 = arith.constant 0 : index
    %22 = vector.load %arg8[%c0_18, %c0_19] : memref<128x128xf32, #tpu.memory_space<vmem>>, vector<128x128xf32>
    %c0_20 = arith.constant 0 : index
    %c0_21 = arith.constant 0 : index
    %23 = vector.load %arg9[%c0_20, %c0_21] : memref<1x128xf32, #tpu.memory_space<vmem>>, vector<1x128xf32>
    %cst_22 = arith.constant dense<0.000000e+00> : vector<128x128xf32>
    %24 = tpu.matmul %21, %22, %cst_22 {dimension_numbers = #tpu.dot_dimension_numbers<[1], [0], [0], [1], [0, 0, 1, 1], [], []>} : vector<128x128xf32>, vector<128x128xf32>, vector<128x128xf32> -> vector<128x128xf32>
    %25 = vector.broadcast %23 : vector<1x128xf32> to vector<128x128xf32>
    %26 = arith.addf %24, %25 : vector<128x128xf32>
    %cst_23 = arith.constant 0.000000e+00 : f32
    %27 = vector.broadcast %cst_23 : f32 to vector<128x128xf32>
    %28 = arith.maximumf %26, %27 : vector<128x128xf32>
    %c0_24 = arith.constant 0 : index
    %c0_25 = arith.constant 0 : index
    %29 = vector.load %arg10[%c0_24, %c0_25] : memref<128x128xf32, #tpu.memory_space<vmem>>, vector<128x128xf32>
    tpu.vector_store %arg10[%c0_24, %c0_25], %28 {strides = array<i32>} : memref<128x128xf32, #tpu.memory_space<vmem>>, vector<128x128xf32>,
    return
  }
  func.func @transform_0(%arg0: i32) -> (i32, i32) {
    %c0_i32 = arith.constant 0 : i32
    %c0_i32_0 = arith.constant 0 : i32
    return %arg0, %c0_i32 : i32, i32
  }
  func.func @transform_1(%arg0: i32) -> (i32, i32) {
    %c0_i32 = arith.constant 0 : i32
    %c0_i32_0 = arith.constant 0 : i32
    %c0_i32_1 = arith.constant 0 : i32
    return %c0_i32, %c0_i32_0 : i32, i32
  }
  func.func @transform_2(%arg0: i32) -> (i32, i32) {
    %c0_i32 = arith.constant 0 : i32
    %c0_i32_0 = arith.constant 0 : i32
    %c0_i32_1 = arith.constant 0 : i32
    return %c0_i32, %c0_i32_0 : i32, i32
  }
  func.func @transform_3(%arg0: i32) -> (i32, i32) {
    %c0_i32 = arith.constant 0 : i32
    %c0_i32_0 = arith.constant 0 : i32
    %c0_i32_1 = arith.constant 0 : i32
    return %c0_i32, %c0_i32_0 : i32, i32
  }
  func.func @transform_4(%arg0: i32) -> (i32, i32) {
    %c0_i32 = arith.constant 0 : i32
    %c0_i32_0 = arith.constant 0 : i32
    %c0_i32_1 = arith.constant 0 : i32
    return %c0_i32, %c0_i32_0 : i32, i32
  }
  func.func @transform_5(%arg0: i32) -> (i32, i32) {
    %c0_i32 = arith.constant 0 : i32
    %c0_i32_0 = arith.constant 0 : i32
    %c0_i32_1 = arith.constant 0 : i32
    return %c0_i32, %c0_i32_0 : i32, i32
  }
  func.func @transform_6(%arg0: i32) -> (i32, i32) {
    %c0_i32 = arith.constant 0 : i32
    %c0_i32_0 = arith.constant 0 : i32
    %c0_i32_1 = arith.constant 0 : i32
    return %c0_i32, %c0_i32_0 : i32, i32
  }
  func.func @transform_7(%arg0: i32) -> (i32, i32) {
    %c0_i32 = arith.constant 0 : i32
    %c0_i32_0 = arith.constant 0 : i32
    %c0_i32_1 = arith.constant 0 : i32
    return %c0_i32, %c0_i32_0 : i32, i32
  }
  func.func @transform_8(%arg0: i32) -> (i32, i32) {
    %c0_i32 = arith.constant 0 : i32
    %c0_i32_0 = arith.constant 0 : i32
    %c0_i32_1 = arith.constant 0 : i32
    return %c0_i32, %c0_i32_0 : i32, i32
  }
  func.func @transform_9(%arg0: i32) -> (i32, i32) {
    %c0_i32 = arith.constant 0 : i32
    %c0_i32_0 = arith.constant 0 : i32
    return %arg0, %c0_i32 : i32, i32
  }
}

</mosaic_0001>

<bundles_post_ra>
// kernel: _ae_forward_padded.1
= control target key start
LH: loop header
LB: loop body
LE: loop exit
PB: predicated region body
PF: predicated region fallthrough
CT: control target
= control target key end

     0   :  { %14 = vsyncpa [#allocation3], 0  ;;  %s862_s0 = inlined_call_operand.vmem [shape: f32[128,128], index: 0, kind: input, shape index: {}]   ;;  %s863_s1 = inlined_call_operand.vmem [shape: f32[128,128], index: 1, kind: input, shape index: {}]   ;;  %s864_s2 = inlined_call_operand.vmem [shape: f32[1,128], index: 2, kind: input, shape index: {}]   ;;  %s865_s3 = inlined_call_operand.hbm [shape: f32[128,128], index: 3, kind: input, shape index: {}]   ;;  %s866_s4 = inlined_call_operand.vmem [shape: f32[1,128], index: 4, kind: input, shape index: {}]   ;;  %s867_s5 = inlined_call_operand.hbm [shape: f32[128,128], index: 5, kind: input, shape index: {}]   ;;  %s868_s6 = inlined_call_operand.vmem [shape: f32[1,128], index: 6, kind: input, shape index: {}]   ;;  %s869_s7 = inlined_call_operand.hbm [shape: f32[128,128], index: 7, kind: input, shape index: {}]   ;;  %s870_s8 = inlined_call_operand.vmem [shape: f32[1,128], index: 8, kind: input, shape index: {}]   ;;  %s871_s9 = inlined_call_operand.vmem [shape: f32[128,128], index: 9, kind: output, shape index: {}]  }
   0x1   :  { %15 = vsyncpa [#allocation5], 0  ;;  %s41_s11 = sshll.u32 %s867_s5, 4  ;;  %s606_s12 = smov [#allocation4]   ;;  %s42_s11 = int_to_ptr.hbm [resolvable:$true] %s41_s11 }
   0x2   :  { %s43_s13 = sshll.u32 %s606_s12, 4  ;;  %s26_s16 = sshll.u32 %s865_s3, 4  ;;  %s44_s13 = int_to_ptr.vmem [resolvable:$true] %s43_s13  ;;  %s27_s16 = int_to_ptr.hbm [resolvable:$true] %s26_s16 }
   0x3   :  { %s607_s17 = smov 128   ;;  %s608_s18 = smov 8  }
   0x4   :  { %49 = dma.hbm_to_vmem [thread:$0]  %s42_s11, 2048, %s44_s13, [#allocation5], %s607_s17, %s607_s17, %s608_s18  }
   0x5   :  { %s609_s19 = smov [#allocation2]   ;;  %s56_s23 = sshll.u32 %s869_s7, 4  ;;  %s57_s23 = int_to_ptr.hbm [resolvable:$true] %s56_s23 }
   0x6   :  { %s28_s20 = sshll.u32 %s609_s19, 4  ;;  %s610_s5 = smov [#allocation6]   ;;  %s29_s20 = int_to_ptr.vmem [resolvable:$true] %s28_s20 }
   0x7   :  { %34 = dma.hbm_to_vmem [thread:$0]  %s27_s16, 2048, %s29_s20, [#allocation3], %s607_s17, %s607_s17, %s608_s18  }
   0x8   :  { %s58_s24 = sshll.u32 %s610_s5, 4  ;;  %s59_s24 = int_to_ptr.vmem [resolvable:$true] %s58_s24 }
   0x9   :  { %64 = dma.hbm_to_vmem [thread:$0]  %s57_s23, 2048, %s59_s24, [#allocation5], %s607_s17, %s607_s17, %s608_s18  }
   0xa   :  { %602 = dma.done.wait [#allocation3], 2048  }
   0xb   :  { %603 = vsyncadd [#allocation3], 4294965248 }
   0xc   :  { %604 = dma.done.wait [#allocation5], 4096  }
   0xd   :  { %605 = vsyncadd [#allocation5], 4294963200  ;;  %v110_v0 = vld [vmem:[%s863_s1 + $0x78] sm:$0xff]  ;;  %v109_v1 = vld [vmem:[%s863_s1 + $0x70] sm:$0xff] }
   0xe   :  { %115 = vmatpush.msra.mxu0 %v110_v0  ;;  %v108_v2 = vld [vmem:[%s863_s1 + $0x68] sm:$0xff]  ;;  %v107_v3 = vld [vmem:[%s863_s1 + $0x60] sm:$0xff]  ;;  %v106_v4 = vld [vmem:[%s863_s1 + $0x58] sm:$0xff] }
   0xf   :  { %v105_v5 = vld [vmem:[%s863_s1 + $0x50] sm:$0xff]  ;;  %v104_v6 = vld [vmem:[%s863_s1 + $0x48] sm:$0xff]  ;;  %v103_v7 = vld [vmem:[%s863_s1 + $0x40] sm:$0xff] }
  0x10   :  { %116 = vmatpush.msra.mxu0 %v109_v1  ;;  %v102_v8 = vld [vmem:[%s863_s1 + $0x38] sm:$0xff]  ;;  %v101_v9 = vld [vmem:[%s863_s1 + $0x30] sm:$0xff]  ;;  %v100_v10 = vld [vmem:[%s863_s1 + $0x28] sm:$0xff] }
  0x11   :  { %v99_v11 = vld [vmem:[%s863_s1 + $0x20] sm:$0xff]  ;;  %v98_v12 = vld [vmem:[%s863_s1 + $0x18] sm:$0xff]  ;;  %v97_v13 = vld [vmem:[%s863_s1 + $0x10] sm:$0xff] }
  0x12   :  { %117 = vmatpush.msra.mxu0 %v108_v2  ;;  %v96_v14 = vld [vmem:[%s863_s1 + $0x8] sm:$0xff]  ;;  %v95_v15 = vld [vmem:[%s863_s1] sm:$0xff]  ;;  %v81_v18 = vld [vmem:[%s862_s0 + $0x10] sm:$0xff] }
  0x13   :  { %v79_v16 = vld [vmem:[%s862_s0] sm:$0xff]  ;;  %v80_v17 = vld [vmem:[%s862_s0 + $0x8] sm:$0xff]  ;;  %v82_v19 = vld [vmem:[%s862_s0 + $0x18] sm:$0xff] }
  0x14   :  { %118 = vmatpush.msra.mxu0 %v107_v3  ;;  %v83_v20 = vld [vmem:[%s862_s0 + $0x20] sm:$0xff]  ;;  %v84_v21 = vld [vmem:[%s862_s0 + $0x28] sm:$0xff]  ;;  %v85_v22 = vld [vmem:[%s862_s0 + $0x30] sm:$0xff] }
  0x15   :  { %v86_v23 = vld [vmem:[%s862_s0 + $0x38] sm:$0xff]  ;;  %v87_v24 = vld [vmem:[%s862_s0 + $0x40] sm:$0xff]  ;;  %v210_v26 = vld [vmem:[#allocation2 + $0x70] sm:$0xff] }
  0x16   :  { %119 = vmatpush.msra.mxu0 %v106_v4  ;;  %v211_v25 = vld [vmem:[#allocation2 + $0x78] sm:$0xff]  ;;  %v209_v27 = vld [vmem:[#allocation2 + $0x68] sm:$0xff]  ;;  %v208_v29 = vld [vmem:[#allocation2 + $0x60] sm:$0xff] }
  0x17   :  { %216 = vmatpush.msra.mxu1 %v211_v25  ;;  %v88_v28 = vld [vmem:[%s862_s0 + $0x48] sm:$0xff]  ;;  %v207_v30 = vld [vmem:[#allocation2 + $0x58] sm:$0xff]  ;;  %v206_v31 = vld [vmem:[#allocation2 + $0x50] sm:$0xff] }
  0x18   :  { %120 = vmatpush.msra.mxu0 %v105_v5  ;;  %v205_v32 = vld [vmem:[#allocation2 + $0x48] sm:$0xff]  ;;  %v89_v33 = vld [vmem:[%s862_s0 + $0x50] sm:$0xff]  ;;  %v204_v34 = vld [vmem:[#allocation2 + $0x40] sm:$0xff] }
  0x19   :  { %217 = vmatpush.msra.mxu1 %v210_v26  ;;  %v203_v35 = vld [vmem:[#allocation2 + $0x38] sm:$0xff]  ;;  %v202_v36 = vld [vmem:[#allocation2 + $0x30] sm:$0xff]  ;;  %v201_v37 = vld [vmem:[#allocation2 + $0x28] sm:$0xff] }
  0x1a   :  { %121 = vmatpush.msra.mxu0 %v104_v6  ;;  %v90_v38 = vld [vmem:[%s862_s0 + $0x58] sm:$0xff]  ;;  %v200_v39 = vld [vmem:[#allocation2 + $0x20] sm:$0xff]  ;;  %v198_v41 = vld [vmem:[#allocation2 + $0x10] sm:$0xff] }
  0x1b   :  { %218 = vmatpush.msra.mxu1 %v209_v27  ;;  %v199_v40 = vld [vmem:[#allocation2 + $0x18] sm:$0xff]  ;;  %v91_v42 = vld [vmem:[%s862_s0 + $0x60] sm:$0xff]  ;;  %v197_v43 = vld [vmem:[#allocation2 + $0x8] sm:$0xff] }
  0x1c   :  { %122 = vmatpush.msra.mxu0 %v103_v7  ;;  %v196_v44 = vld [vmem:[#allocation2] sm:$0xff]  ;;  %v92_v45 = vld [vmem:[%s862_s0 + $0x68] sm:$0xff]  ;;  %v93_v46 = vld [vmem:[%s862_s0 + $0x70] sm:$0xff] }
  0x1d   :  { %219 = vmatpush.msra.mxu1 %v208_v29  ;;  %v94_v47 = vld [vmem:[%s862_s0 + $0x78] sm:$0xff]  ;;  %v769_v48 = vld [vmem:[%s864_s2] ss:$0 sm:$0xff]  ;;  %v303_v29 = vld [vmem:[#allocation4 + $0x30] sm:$0xff] }
  0x1e   :  { %123 = vmatpush.msra.mxu0 %v102_v8  ;;  %v305_v25 = vld [vmem:[#allocation4 + $0x40] sm:$0xff]  ;;  %v304_v26 = vld [vmem:[#allocation4 + $0x38] sm:$0xff] }
  0x1f   :  { %220 = vmatpush.msra.mxu1 %v207_v30 }
  0x20   :  { %124 = vmatpush.msra.mxu0 %v101_v9 }
  0x21   :  { %221 = vmatpush.msra.mxu1 %v206_v31  ;;  %v302_v31 = vld [vmem:[#allocation4 + $0x28] sm:$0xff] }
  0x22   :  { %125 = vmatpush.msra.mxu0 %v100_v10 }
  0x23   :  { %222 = vmatpush.msra.mxu1 %v205_v32  ;;  %v301_v32 = vld [vmem:[#allocation4 + $0x20] sm:$0xff] }
  0x24   :  { %126 = vmatpush.msra.mxu0 %v99_v11 }
  0x25   :  { %223 = vmatpush.msra.mxu1 %v204_v34 }
  0x26   :  { %127 = vmatpush.msra.mxu0 %v98_v12  ;;  %v312_v12 = vld [vmem:[#allocation4 + $0x78] sm:$0xff] }
  0x27   :  { %224 = vmatpush.msra.mxu1 %v203_v35  ;;  %317 = vmatpush.msra.mxu2 %v312_v12 }
  0x28   :  { %128 = vmatpush.msra.mxu0 %v97_v13 }
  0x29   :  { %225 = vmatpush.msra.mxu1 %v202_v36  ;;  %v299_v36 = vld [vmem:[#allocation4 + $0x10] sm:$0xff] }
  0x2a   :  { %129 = vmatpush.msra.mxu0 %v96_v14 }
  0x2b   :  { %226 = vmatpush.msra.mxu1 %v201_v37 }
  0x2c   :  { %130 = vmatpush.msra.mxu0 %v95_v15  ;;  %v311_v15 = vld [vmem:[#allocation4 + $0x70] sm:$0xff] }
  0x2d   :  { %131 = vmatmul.f32.vlgmr.msra.gmra.mxu0 %v79_v16  ;;  %227 = vmatpush.msra.mxu1 %v200_v39  ;;  %v297_v39 = vld [vmem:[#allocation4] sm:$0xff] }
  0x2e   :  { %318 = vmatpush.msra.mxu2 %v311_v15 }
  0x2f   :  { %228 = vmatpush.msra.mxu1 %v199_v40 }
  0x31   :  { %229 = vmatpush.msra.mxu1 %v198_v41 }
  0x33   :  { %230 = vmatpush.msra.mxu1 %v197_v43 }
  0x35   :  { %134 = vmatmul.f32.gmra.mxu0 %v80_v17  ;;  %231 = vmatpush.msra.mxu1 %v196_v44  ;;  %v310_v17 = vld [vmem:[#allocation4 + $0x68] sm:$0xff] }
  0x36   :  { %319 = vmatpush.msra.mxu2 %v310_v17  ;;  %v412_v17 = vld [vmem:[#allocation6 + $0x70] sm:$0xff] }
  0x3d   :  { %137 = vmatmul.f32.gmra.mxu0 %v81_v18  ;;  %v309_v18 = vld [vmem:[#allocation4 + $0x60] sm:$0xff] }
  0x3e   :  { %320 = vmatpush.msra.mxu2 %v309_v18 }
  0x45   :  { %140 = vmatmul.f32.gmra.mxu0 %v82_v19  ;;  %v308_v19 = vld [vmem:[#allocation4 + $0x58] sm:$0xff] }
  0x46   :  { %321 = vmatpush.msra.mxu2 %v308_v19 }
  0x4d   :  { %143 = vmatmul.f32.gmra.mxu0 %v83_v20 }
  0x55   :  { %146 = vmatmul.f32.gmra.mxu0 %v84_v21 }
  0x5d   :  { %149 = vmatmul.f32.gmra.mxu0 %v85_v22  ;;  %v307_v22 = vld [vmem:[#allocation4 + $0x50] sm:$0xff] }
  0x5e   :  { %322 = vmatpush.msra.mxu2 %v307_v22  ;;  %v410_v22 = vld [vmem:[#allocation6 + $0x60] sm:$0xff] }
  0x65   :  { %152 = vmatmul.f32.gmra.mxu0 %v86_v23 }
  0x6d   :  { %155 = vmatmul.f32.gmra.mxu0 %v87_v24  ;;  %v306_v24 = vld [vmem:[#allocation4 + $0x48] sm:$0xff] }
  0x6e   :  { %323 = vmatpush.msra.mxu2 %v306_v24  ;;  %v408_v24 = vld [vmem:[#allocation6 + $0x50] sm:$0xff] }
  0x70   :  { %324 = vmatpush.msra.mxu2 %v305_v25 }
  0x72   :  { %325 = vmatpush.msra.mxu2 %v304_v26 }
  0x74   :  { %326 = vmatpush.msra.mxu2 %v303_v29  ;;  %v406_v29 = vld [vmem:[#allocation6 + $0x40] sm:$0xff] }
  0x75   :  { %158 = vmatmul.f32.gmra.mxu0 %v88_v28 }
  0x76   :  { %327 = vmatpush.msra.mxu2 %v302_v31  ;;  %v404_v31 = vld [vmem:[#allocation6 + $0x30] sm:$0xff] }
  0x78   :  { %328 = vmatpush.msra.mxu2 %v301_v32  ;;  %v403_v32 = vld [vmem:[#allocation6 + $0x28] sm:$0xff] }
  0x7d   :  { %161 = vmatmul.f32.gmra.mxu0 %v89_v33  ;;  %v300_v33 = vld [vmem:[#allocation4 + $0x18] sm:$0xff] }
  0x7e   :  { %329 = vmatpush.msra.mxu2 %v300_v33 }
  0x80   :  { %330 = vmatpush.msra.mxu2 %v299_v36 }
  0x85   :  { %164 = vmatmul.f32.gmra.mxu0 %v90_v38  ;;  %v298_v38 = vld [vmem:[#allocation4 + $0x8] sm:$0xff] }
  0x86   :  { %331 = vmatpush.msra.mxu2 %v298_v38  ;;  %v400_v38 = vld [vmem:[#allocation6 + $0x10] sm:$0xff] }
  0x88   :  { %332 = vmatpush.msra.mxu2 %v297_v39 }
  0x8d   :  { %167 = vmatmul.f32.gmra.mxu0 %v91_v42 }
  0x95   :  { %170 = vmatmul.f32.gmra.mxu0 %v92_v45 }
  0x9d   :  { %173 = vmatmul.f32.gmra.mxu0 %v93_v46 }
  0xa5   :  { %176 = vmatmul.f32.gmra.mxu0 %v94_v47 }
  0xaa   :  { %v132_v49 = vpop.f32.mrf.mxu0 }
  0xab   :  { %v133_v50 = vadd.f32 %v769_v48, %v132_v49 }
  0xad   :  { %v180_v51 = vmax.f32 %v133_v50, 0.0  ;;  %v790_v50 = vld [vmem:[%s866_s4] ss:$0 sm:$0xff] }
  0xaf   :  { %232 = vmatmul.f32.vlgmr.msra.gmra.mxu1 %v180_v51 }
  0xb2   :  { %v135_v52 = vpop.f32.mrf.mxu0 }
  0xb3   :  { %v136_v53 = vadd.f32 %v769_v48, %v135_v52 }
  0xb5   :  { %v181_v54 = vmax.f32 %v136_v53, 0.0 }
  0xb7   :  { %235 = vmatmul.f32.gmra.mxu1 %v181_v54 }
  0xba   :  { %v138_v55 = vpop.f32.mrf.mxu0 }
  0xbb   :  { %v139_v56 = vadd.f32 %v769_v48, %v138_v55 }
  0xbd   :  { %v182_v57 = vmax.f32 %v139_v56, 0.0 }
  0xbf   :  { %238 = vmatmul.f32.gmra.mxu1 %v182_v57 }
  0xc2   :  { %v141_v58 = vpop.f32.mrf.mxu0 }
  0xc3   :  { %v142_v59 = vadd.f32 %v769_v48, %v141_v58 }
  0xc5   :  { %v183_v60 = vmax.f32 %v142_v59, 0.0 }
  0xc7   :  { %241 = vmatmul.f32.gmra.mxu1 %v183_v60 }
  0xca   :  { %v144_v61 = vpop.f32.mrf.mxu0 }
  0xcb   :  { %v145_v62 = vadd.f32 %v769_v48, %v144_v61 }
  0xcd   :  { %v184_v63 = vmax.f32 %v145_v62, 0.0 }
  0xcf   :  { %244 = vmatmul.f32.gmra.mxu1 %v184_v63 }
  0xd2   :  { %v147_v0 = vpop.f32.mrf.mxu0 }
  0xd3   :  { %v148_v1 = vadd.f32 %v769_v48, %v147_v0 }
  0xd5   :  { %v185_v2 = vmax.f32 %v148_v1, 0.0 }
  0xd7   :  { %247 = vmatmul.f32.gmra.mxu1 %v185_v2 }
  0xda   :  { %v150_v3 = vpop.f32.mrf.mxu0 }
  0xdb   :  { %v151_v4 = vadd.f32 %v769_v48, %v150_v3 }
  0xdd   :  { %v186_v5 = vmax.f32 %v151_v4, 0.0 }
  0xdf   :  { %250 = vmatmul.f32.gmra.mxu1 %v186_v5 }
  0xe2   :  { %v153_v6 = vpop.f32.mrf.mxu0 }
  0xe3   :  { %v154_v7 = vadd.f32 %v769_v48, %v153_v6 }
  0xe5   :  { %v187_v8 = vmax.f32 %v154_v7, 0.0 }
  0xe7   :  { %253 = vmatmul.f32.gmra.mxu1 %v187_v8 }
  0xea   :  { %v156_v9 = vpop.f32.mrf.mxu0 }
  0xeb   :  { %v157_v10 = vadd.f32 %v769_v48, %v156_v9 }
  0xed   :  { %v188_v11 = vmax.f32 %v157_v10, 0.0 }
  0xef   :  { %256 = vmatmul.f32.gmra.mxu1 %v188_v11 }
  0xf2   :  { %v159_v13 = vpop.f32.mrf.mxu0 }
  0xf3   :  { %v160_v14 = vadd.f32 %v769_v48, %v159_v13 }
  0xf5   :  { %v189_v16 = vmax.f32 %v160_v14, 0.0 }
  0xf7   :  { %259 = vmatmul.f32.gmra.mxu1 %v189_v16  ;;  %v413_v16 = vld [vmem:[#allocation6 + $0x78] sm:$0xff] }
  0xf8   :  { %418 = vmatpush.msra.mxu3 %v413_v16 }
  0xfa   :  { %v162_v20 = vpop.f32.mrf.mxu0  ;;  %419 = vmatpush.msra.mxu3 %v412_v17 }
  0xfb   :  { %v163_v21 = vadd.f32 %v769_v48, %v162_v20  ;;  %v411_v20 = vld [vmem:[#allocation6 + $0x68] sm:$0xff] }
  0xfc   :  { %420 = vmatpush.msra.mxu3 %v411_v20 }
  0xfd   :  { %v190_v23 = vmax.f32 %v163_v21, 0.0 }
  0xfe   :  { %421 = vmatpush.msra.mxu3 %v410_v22 }
  0xff   :  { %262 = vmatmul.f32.gmra.mxu1 %v190_v23  ;;  %v409_v23 = vld [vmem:[#allocation6 + $0x58] sm:$0xff] }
 0x100   :  { %422 = vmatpush.msra.mxu3 %v409_v23 }
 0x102   :  { %v165_v27 = vpop.f32.mrf.mxu0  ;;  %423 = vmatpush.msra.mxu3 %v408_v24 }
 0x103   :  { %v166_v28 = vadd.f32 %v769_v48, %v165_v27  ;;  %v407_v27 = vld [vmem:[#allocation6 + $0x48] sm:$0xff] }
 0x104   :  { %424 = vmatpush.msra.mxu3 %v407_v27 }
 0x105   :  { %v191_v30 = vmax.f32 %v166_v28, 0.0 }
 0x106   :  { %425 = vmatpush.msra.mxu3 %v406_v29 }
 0x107   :  { %265 = vmatmul.f32.gmra.mxu1 %v191_v30  ;;  %v405_v30 = vld [vmem:[#allocation6 + $0x38] sm:$0xff] }
 0x108   :  { %426 = vmatpush.msra.mxu3 %v405_v30 }
 0x10a   :  { %v168_v34 = vpop.f32.mrf.mxu0  ;;  %427 = vmatpush.msra.mxu3 %v404_v31 }
 0x10b   :  { %v169_v35 = vadd.f32 %v769_v48, %v168_v34 }
 0x10c   :  { %428 = vmatpush.msra.mxu3 %v403_v32 }
 0x10d   :  { %v192_v37 = vmax.f32 %v169_v35, 0.0  ;;  %v402_v35 = vld [vmem:[#allocation6 + $0x20] sm:$0xff] }
 0x10e   :  { %429 = vmatpush.msra.mxu3 %v402_v35  ;;  %v529_v35 = vld [vmem:[%s870_s8] ss:$0 sm:$0xff] }
 0x10f   :  { %268 = vmatmul.f32.gmra.mxu1 %v192_v37  ;;  %v401_v37 = vld [vmem:[#allocation6 + $0x18] sm:$0xff] }
 0x110   :  { %430 = vmatpush.msra.mxu3 %v401_v37 }
 0x112   :  { %v171_v40 = vpop.f32.mrf.mxu0  ;;  %431 = vmatpush.msra.mxu3 %v400_v38 }
 0x113   :  { %v172_v41 = vadd.f32 %v769_v48, %v171_v40 }
 0x115   :  { %v193_v42 = vmax.f32 %v172_v41, 0.0  ;;  %v399_v41 = vld [vmem:[#allocation6 + $0x8] sm:$0xff] }
 0x116   :  { %432 = vmatpush.msra.mxu3 %v399_v41 }
 0x117   :  { %271 = vmatmul.f32.gmra.mxu1 %v193_v42 }
 0x11a   :  { %v174_v43 = vpop.f32.mrf.mxu0 }
 0x11b   :  { %v175_v44 = vadd.f32 %v769_v48, %v174_v43  ;;  %v398_v43 = vld [vmem:[#allocation6] sm:$0xff] }
 0x11c   :  { %433 = vmatpush.msra.mxu3 %v398_v43 }
 0x11d   :  { %v194_v45 = vmax.f32 %v175_v44, 0.0 }
 0x11f   :  { %274 = vmatmul.f32.gmra.mxu1 %v194_v45 }
 0x122   :  { %v177_v46 = vpop.f32.mrf.mxu0 }
 0x123   :  { %v178_v47 = vadd.f32 %v769_v48, %v177_v46 }
 0x125   :  { %v195_v49 = vmax.f32 %v178_v47, 0.0 }
 0x127   :  { %277 = vmatmul.f32.gmra.mxu1 %v195_v49 }
 0x12c   :  { %v233_v51 = vpop.f32.mrf.mxu1 }
 0x12d   :  { %v234_v52 = vadd.f32 %v790_v50, %v233_v51 }
 0x12f   :  { %v281_v53 = vmax.f32 %v234_v52, 0.0  ;;  %v528_v52 = vld [vmem:[%s868_s6] ss:$0 sm:$0xff] }
 0x131   :  { %333 = vmatmul.f32.vlgmr.msra.gmra.mxu2 %v281_v53 }
 0x134   :  { %v236_v54 = vpop.f32.mrf.mxu1 }
 0x135   :  { %v237_v55 = vadd.f32 %v790_v50, %v236_v54 }
 0x137   :  { %v282_v56 = vmax.f32 %v237_v55, 0.0 }
 0x139   :  { %336 = vmatmul.f32.gmra.mxu2 %v282_v56 }
 0x13c   :  { %v239_v57 = vpop.f32.mrf.mxu1 }
 0x13d   :  { %v240_v48 = vadd.f32 %v790_v50, %v239_v57 }
 0x13f   :  { %v283_v58 = vmax.f32 %v240_v48, 0.0 }
 0x141   :  { %339 = vmatmul.f32.gmra.mxu2 %v283_v58 }
 0x144   :  { %v242_v59 = vpop.f32.mrf.mxu1 }
 0x145   :  { %v243_v60 = vadd.f32 %v790_v50, %v242_v59 }
 0x147   :  { %v284_v61 = vmax.f32 %v243_v60, 0.0 }
 0x149   :  { %342 = vmatmul.f32.gmra.mxu2 %v284_v61 }
 0x14c   :  { %v245_v62 = vpop.f32.mrf.mxu1 }
 0x14d   :  { %v246_v63 = vadd.f32 %v790_v50, %v245_v62 }
 0x14f   :  { %v285_v0 = vmax.f32 %v246_v63, 0.0 }
 0x151   :  { %345 = vmatmul.f32.gmra.mxu2 %v285_v0 }
 0x154   :  { %v248_v1 = vpop.f32.mrf.mxu1 }
 0x155   :  { %v249_v2 = vadd.f32 %v790_v50, %v248_v1 }
 0x157   :  { %v286_v3 = vmax.f32 %v249_v2, 0.0 }
 0x159   :  { %348 = vmatmul.f32.gmra.mxu2 %v286_v3 }
 0x15c   :  { %v251_v4 = vpop.f32.mrf.mxu1 }
 0x15d   :  { %v252_v5 = vadd.f32 %v790_v50, %v251_v4 }
 0x15f   :  { %v287_v6 = vmax.f32 %v252_v5, 0.0 }
 0x161   :  { %351 = vmatmul.f32.gmra.mxu2 %v287_v6 }
 0x164   :  { %v254_v7 = vpop.f32.mrf.mxu1 }
 0x165   :  { %v255_v8 = vadd.f32 %v790_v50, %v254_v7 }
 0x167   :  { %v288_v9 = vmax.f32 %v255_v8, 0.0 }
 0x169   :  { %354 = vmatmul.f32.gmra.mxu2 %v288_v9 }
 0x16c   :  { %v257_v10 = vpop.f32.mrf.mxu1 }
 0x16d   :  { %v258_v11 = vadd.f32 %v790_v50, %v257_v10 }
 0x16f   :  { %v289_v12 = vmax.f32 %v258_v11, 0.0 }
 0x171   :  { %357 = vmatmul.f32.gmra.mxu2 %v289_v12 }
 0x174   :  { %v260_v13 = vpop.f32.mrf.mxu1 }
 0x175   :  { %v261_v14 = vadd.f32 %v790_v50, %v260_v13 }
 0x177   :  { %v290_v15 = vmax.f32 %v261_v14, 0.0 }
 0x179   :  { %360 = vmatmul.f32.gmra.mxu2 %v290_v15 }
 0x17c   :  { %v263_v18 = vpop.f32.mrf.mxu1 }
 0x17d   :  { %v264_v19 = vadd.f32 %v790_v50, %v263_v18 }
 0x17f   :  { %v291_v21 = vmax.f32 %v264_v19, 0.0 }
 0x181   :  { %363 = vmatmul.f32.gmra.mxu2 %v291_v21 }
 0x184   :  { %v266_v25 = vpop.f32.mrf.mxu1 }
 0x185   :  { %v267_v26 = vadd.f32 %v790_v50, %v266_v25 }
 0x187   :  { %v292_v28 = vmax.f32 %v267_v26, 0.0 }
 0x189   :  { %366 = vmatmul.f32.gmra.mxu2 %v292_v28 }
 0x18c   :  { %v269_v33 = vpop.f32.mrf.mxu1 }
 0x18d   :  { %v270_v34 = vadd.f32 %v790_v50, %v269_v33 }
 0x18f   :  { %v293_v36 = vmax.f32 %v270_v34, 0.0 }
 0x191   :  { %369 = vmatmul.f32.gmra.mxu2 %v293_v36 }
 0x194   :  { %v272_v39 = vpop.f32.mrf.mxu1 }
 0x195   :  { %v273_v40 = vadd.f32 %v790_v50, %v272_v39 }
 0x197   :  { %v294_v42 = vmax.f32 %v273_v40, 0.0 }
 0x199   :  { %372 = vmatmul.f32.gmra.mxu2 %v294_v42 }
 0x19c   :  { %v275_v44 = vpop.f32.mrf.mxu1 }
 0x19d   :  { %v276_v45 = vadd.f32 %v790_v50, %v275_v44 }
 0x19f   :  { %v295_v46 = vmax.f32 %v276_v45, 0.0 }
 0x1a1   :  { %375 = vmatmul.f32.gmra.mxu2 %v295_v46 }
 0x1a4   :  { %v278_v47 = vpop.f32.mrf.mxu1 }
 0x1a5   :  { %v279_v49 = vadd.f32 %v790_v50, %v278_v47 }
 0x1a7   :  { %v296_v51 = vmax.f32 %v279_v49, 0.0 }
 0x1a9   :  { %378 = vmatmul.f32.gmra.mxu2 %v296_v51 }
 0x1b4   :  { %v334_v53 = vpop.f32.mrf.mxu2 }
 0x1b5   :  { %v335_v54 = vadd.f32 %v528_v52, %v334_v53 }
 0x1b7   :  { %v382_v55 = vmax.f32 %v335_v54, 0.0 }
 0x1b9   :  { %434 = vmatmul.f32.vlgmr.msra.gmra.mxu3 %v382_v55 }
 0x1bc   :  { %v337_v56 = vpop.f32.mrf.mxu2 }
 0x1bd   :  { %v338_v57 = vadd.f32 %v528_v52, %v337_v56 }
 0x1bf   :  { %v383_v48 = vmax.f32 %v338_v57, 0.0 }
 0x1c1   :  { %437 = vmatmul.f32.gmra.mxu3 %v383_v48 }
 0x1c4   :  { %v340_v58 = vpop.f32.mrf.mxu2 }
 0x1c5   :  { %v341_v59 = vadd.f32 %v528_v52, %v340_v58 }
 0x1c7   :  { %v384_v60 = vmax.f32 %v341_v59, 0.0 }
 0x1c9   :  { %440 = vmatmul.f32.gmra.mxu3 %v384_v60 }
 0x1cc   :  { %v343_v61 = vpop.f32.mrf.mxu2 }
 0x1cd   :  { %v344_v50 = vadd.f32 %v528_v52, %v343_v61 }
 0x1cf   :  { %v385_v62 = vmax.f32 %v344_v50, 0.0 }
 0x1d1   :  { %443 = vmatmul.f32.gmra.mxu3 %v385_v62 }
 0x1d4   :  { %v346_v63 = vpop.f32.mrf.mxu2 }
 0x1d5   :  { %v347_v0 = vadd.f32 %v528_v52, %v346_v63 }
 0x1d7   :  { %v386_v1 = vmax.f32 %v347_v0, 0.0 }
 0x1d9   :  { %446 = vmatmul.f32.gmra.mxu3 %v386_v1 }
 0x1dc   :  { %v349_v2 = vpop.f32.mrf.mxu2 }
 0x1dd   :  { %v350_v3 = vadd.f32 %v528_v52, %v349_v2 }
 0x1df   :  { %v387_v4 = vmax.f32 %v350_v3, 0.0 }
 0x1e1   :  { %449 = vmatmul.f32.gmra.mxu3 %v387_v4 }
 0x1e4   :  { %v352_v5 = vpop.f32.mrf.mxu2 }
 0x1e5   :  { %v353_v6 = vadd.f32 %v528_v52, %v352_v5 }
 0x1e7   :  { %v388_v7 = vmax.f32 %v353_v6, 0.0 }
 0x1e9   :  { %452 = vmatmul.f32.gmra.mxu3 %v388_v7 }
 0x1ec   :  { %v355_v8 = vpop.f32.mrf.mxu2 }
 0x1ed   :  { %v356_v9 = vadd.f32 %v528_v52, %v355_v8 }
 0x1ef   :  { %v389_v10 = vmax.f32 %v356_v9, 0.0 }
 0x1f1   :  { %455 = vmatmul.f32.gmra.mxu3 %v389_v10 }
 0x1f4   :  { %v358_v11 = vpop.f32.mrf.mxu2 }
 0x1f5   :  { %v359_v12 = vadd.f32 %v528_v52, %v358_v11 }
 0x1f7   :  { %v390_v13 = vmax.f32 %v359_v12, 0.0 }
 0x1f9   :  { %458 = vmatmul.f32.gmra.mxu3 %v390_v13 }
 0x1fc   :  { %v361_v14 = vpop.f32.mrf.mxu2 }
 0x1fd   :  { %v362_v15 = vadd.f32 %v528_v52, %v361_v14 }
 0x1ff   :  { %v391_v16 = vmax.f32 %v362_v15, 0.0 }
 0x201   :  { %461 = vmatmul.f32.gmra.mxu3 %v391_v16 }
 0x204   :  { %v364_v17 = vpop.f32.mrf.mxu2 }
 0x205   :  { %v365_v18 = vadd.f32 %v528_v52, %v364_v17 }
 0x207   :  { %v392_v19 = vmax.f32 %v365_v18, 0.0 }
 0x209   :  { %464 = vmatmul.f32.gmra.mxu3 %v392_v19 }
 0x20c   :  { %v367_v20 = vpop.f32.mrf.mxu2 }
 0x20d   :  { %v368_v21 = vadd.f32 %v528_v52, %v367_v20 }
 0x20f   :  { %v393_v22 = vmax.f32 %v368_v21, 0.0 }
 0x211   :  { %467 = vmatmul.f32.gmra.mxu3 %v393_v22 }
 0x214   :  { %v370_v23 = vpop.f32.mrf.mxu2 }
 0x215   :  { %v371_v24 = vadd.f32 %v528_v52, %v370_v23 }
 0x217   :  { %v394_v25 = vmax.f32 %v371_v24, 0.0 }
 0x219   :  { %470 = vmatmul.f32.gmra.mxu3 %v394_v25 }
 0x21c   :  { %v373_v26 = vpop.f32.mrf.mxu2 }
 0x21d   :  { %v374_v27 = vadd.f32 %v528_v52, %v373_v26 }
 0x21f   :  { %v395_v28 = vmax.f32 %v374_v27, 0.0 }
 0x221   :  { %473 = vmatmul.f32.gmra.mxu3 %v395_v28 }
 0x224   :  { %v376_v29 = vpop.f32.mrf.mxu2 }
 0x225   :  { %v377_v30 = vadd.f32 %v528_v52, %v376_v29 }
 0x227   :  { %v396_v31 = vmax.f32 %v377_v30, 0.0 }
 0x229   :  { %476 = vmatmul.f32.gmra.mxu3 %v396_v31 }
 0x22c   :  { %v379_v32 = vpop.f32.mrf.mxu2 }
 0x22d   :  { %v380_v33 = vadd.f32 %v528_v52, %v379_v32 }
 0x22f   :  { %v397_v34 = vmax.f32 %v380_v33, 0.0 }
 0x231   :  { %479 = vmatmul.f32.gmra.mxu3 %v397_v34 }
 0x23c   :  { %v435_v36 = vpop.f32.mrf.mxu3 }
 0x23d   :  { %v436_v37 = vadd.f32 %v529_v35, %v435_v36 }
 0x23f   :  { %v483_v38 = vmax.f32 %v436_v37, 0.0 }
 0x241   :  { %499 = vst [vmem:[%s871_s9] sm:$0xff] %v483_v38 }
 0x244   :  { %v438_v39 = vpop.f32.mrf.mxu3 }
 0x245   :  { %v439_v40 = vadd.f32 %v529_v35, %v438_v39 }
 0x247   :  { %v484_v41 = vmax.f32 %v439_v40, 0.0 }
 0x249   :  { %500 = vst [vmem:[%s871_s9 + $0x8] sm:$0xff] %v484_v41 }
 0x24c   :  { %v441_v42 = vpop.f32.mrf.mxu3 }
 0x24d   :  { %v442_v43 = vadd.f32 %v529_v35, %v441_v42 }
 0x24f   :  { %v485_v44 = vmax.f32 %v442_v43, 0.0 }
 0x251   :  { %501 = vst [vmem:[%s871_s9 + $0x10] sm:$0xff] %v485_v44 }
 0x254   :  { %v444_v45 = vpop.f32.mrf.mxu3 }
 0x255   :  { %v445_v46 = vadd.f32 %v529_v35, %v444_v45 }
 0x257   :  { %v486_v47 = vmax.f32 %v445_v46, 0.0 }
 0x259   :  { %502 = vst [vmem:[%s871_s9 + $0x18] sm:$0xff] %v486_v47 }
 0x25c   :  { %v447_v49 = vpop.f32.mrf.mxu3 }
 0x25d   :  { %v448_v51 = vadd.f32 %v529_v35, %v447_v49 }
 0x25f   :  { %v487_v52 = vmax.f32 %v448_v51, 0.0 }
 0x261   :  { %503 = vst [vmem:[%s871_s9 + $0x20] sm:$0xff] %v487_v52 }
 0x264   :  { %v450_v53 = vpop.f32.mrf.mxu3 }
 0x265   :  { %v451_v54 = vadd.f32 %v529_v35, %v450_v53 }
 0x267   :  { %v488_v55 = vmax.f32 %v451_v54, 0.0 }
 0x269   :  { %504 = vst [vmem:[%s871_s9 + $0x28] sm:$0xff] %v488_v55 }
 0x26c   :  { %v453_v56 = vpop.f32.mrf.mxu3 }
 0x26d   :  { %v454_v57 = vadd.f32 %v529_v35, %v453_v56 }
 0x26f   :  { %v489_v48 = vmax.f32 %v454_v57, 0.0 }
 0x271   :  { %505 = vst [vmem:[%s871_s9 + $0x30] sm:$0xff] %v489_v48 }
 0x274   :  { %v456_v58 = vpop.f32.mrf.mxu3 }
 0x275   :  { %v457_v59 = vadd.f32 %v529_v35, %v456_v58 }
 0x277   :  { %v490_v60 = vmax.f32 %v457_v59, 0.0 }
 0x279   :  { %506 = vst [vmem:[%s871_s9 + $0x38] sm:$0xff] %v490_v60 }
 0x27c   :  { %v459_v61 = vpop.f32.mrf.mxu3 }
 0x27d   :  { %v460_v50 = vadd.f32 %v529_v35, %v459_v61 }
 0x27f   :  { %v491_v62 = vmax.f32 %v460_v50, 0.0 }
 0x281   :  { %507 = vst [vmem:[%s871_s9 + $0x40] sm:$0xff] %v491_v62 }
 0x284   :  { %v462_v63 = vpop.f32.mrf.mxu3 }
 0x285   :  { %v463_v0 = vadd.f32 %v529_v35, %v462_v63 }
 0x287   :  { %v492_v1 = vmax.f32 %v463_v0, 0.0 }
 0x289   :  { %508 = vst [vmem:[%s871_s9 + $0x48] sm:$0xff] %v492_v1 }
 0x28c   :  { %v465_v2 = vpop.f32.mrf.mxu3 }
 0x28d   :  { %v466_v3 = vadd.f32 %v529_v35, %v465_v2 }
 0x28f   :  { %v493_v4 = vmax.f32 %v466_v3, 0.0 }
 0x291   :  { %509 = vst [vmem:[%s871_s9 + $0x50] sm:$0xff] %v493_v4 }
 0x294   :  { %v468_v5 = vpop.f32.mrf.mxu3 }
 0x295   :  { %v469_v6 = vadd.f32 %v529_v35, %v468_v5 }
 0x297   :  { %v494_v7 = vmax.f32 %v469_v6, 0.0 }
 0x299   :  { %510 = vst [vmem:[%s871_s9 + $0x58] sm:$0xff] %v494_v7 }
 0x29c   :  { %v471_v8 = vpop.f32.mrf.mxu3 }
 0x29d   :  { %v472_v9 = vadd.f32 %v529_v35, %v471_v8 }
 0x29f   :  { %v495_v10 = vmax.f32 %v472_v9, 0.0 }
 0x2a1   :  { %511 = vst [vmem:[%s871_s9 + $0x60] sm:$0xff] %v495_v10 }
 0x2a4   :  { %v474_v11 = vpop.f32.mrf.mxu3 }
 0x2a5   :  { %v475_v12 = vadd.f32 %v529_v35, %v474_v11 }
 0x2a7   :  { %v496_v13 = vmax.f32 %v475_v12, 0.0 }
 0x2a9   :  { %512 = vst [vmem:[%s871_s9 + $0x68] sm:$0xff] %v496_v13 }
 0x2ac   :  { %v477_v14 = vpop.f32.mrf.mxu3 }
 0x2ad   :  { %v478_v15 = vadd.f32 %v529_v35, %v477_v14 }
 0x2af   :  { %v497_v16 = vmax.f32 %v478_v15, 0.0 }
 0x2b1   :  { %513 = vst [vmem:[%s871_s9 + $0x70] sm:$0xff] %v497_v16 }
 0x2b4   :  { %v480_v17 = vpop.f32.mrf.mxu3 }
 0x2b5   :  { %v481_v18 = vadd.f32 %v529_v35, %v480_v17 }
 0x2b7   :  { %v498_v19 = vmax.f32 %v481_v18, 0.0 }
 0x2b9   :  { %514 = vst [vmem:[%s871_s9 + $0x78] sm:$0xff] %v498_v19 }
 0x2ba   :  { %519 = vsyncpa [#allocation3], 1 }
 0x2bb   :  { %520 = vsyncpa [#allocation5], 1 }

</bundles_post_ra>
